<compile_context>
chip_gen: v6e
topology: v6e:2x2x1
jax: 0.10.0
libtpu: 0.0.40
codegen_flags: <defaults>
</compile_context>

<pallas_src>
import functools

import jax
import jax.numpy as jnp
from jax.experimental import pallas as pl
from jax.experimental.pallas import tpu as pltpu


def _ca_kernel(x_ref, w1t_ref, w2t_ref, o_ref, *, hw_valid):
    # x_ref: (Bt, C4, HW_pad)   w1t_ref: (C4, hid)   w2t_ref: (hid, C4)
    x = x_ref[...]                       # native dtype end-to-end (no f32 copy)
    w1t = w1t_ref[...]                   # native-dtype weights (MXU-native path)
    w2t = w2t_ref[...]
    bt, _, hw_pad = x.shape

    # AdaptiveAvgPool2d(1) / AdaptiveMaxPool2d(1): lane reduces, sum in f32.
    p_sum = jnp.sum(x, axis=-1, dtype=jnp.float32)                 # (Bt, C4)
    p_avg = p_sum * jnp.float32(1.0 / hw_valid)
    if hw_valid != hw_pad:
        # Spatial axis was zero-padded to a lane-dense multiple of 128: zeros
        # are fine for the sum, but the max must exclude padded lanes.
        lane = jax.lax.broadcasted_iota(jnp.int32, (1, 1, hw_pad), 2)
        if jnp.issubdtype(x.dtype, jnp.floating):
            fill = jnp.asarray(-jnp.inf, dtype=x.dtype)
        else:
            fill = jnp.asarray(jnp.iinfo(x.dtype).min, dtype=x.dtype)
        p_max = jnp.max(jnp.where(lane < hw_valid, x, fill), axis=-1)
    else:
        p_max = jnp.max(x, axis=-1)
    p_max = p_max.astype(jnp.float32)                              # (Bt, C4)

    # Shared MLP, fully fused:
    #   one first-layer dot over [p_max; p_avg], relu, add the halves
    #   (valid because the 2nd 1x1 conv is linear), one second-layer dot.
    p = jnp.concatenate([p_max, p_avg], axis=0).astype(w1t.dtype)  # (2*Bt, C4)
    h = jnp.maximum(jnp.dot(p, w1t, preferred_element_type=jnp.float32), 0.0)
    h = h[:bt] + h[bt:]                                            # (Bt, hid)
    y = jnp.dot(h.astype(w2t.dtype), w2t, preferred_element_type=jnp.float32)
    scale = jax.nn.sigmoid(y)                                      # (Bt, C4)

    # Apply per-channel scale in the input's native dtype; only the tiny scale
    # vector is down-cast.
    o_ref[...] = (x * scale[:, :, None].astype(x.dtype)).astype(o_ref.dtype)


def _device_info():
    """Best-effort generation detection: (multi_tensorcore, vmem_capacity)."""
    kind = ""
    try:
        kind = jax.devices()[0].device_kind.lower()
    except Exception:
        pass
    multi_tc = "v7" in kind
    vmem_cap = None
    try:
        vmem_cap = int(pltpu.get_tpu_info().vmem_capacity_bytes)
    except Exception:
        vmem_cap = None
    if vmem_cap is None:
        vmem_cap = (64 << 20) if multi_tc else (128 << 20)
    return multi_tc, vmem_cap


def _choose_bt(B, per_image_bytes, target_block_bytes, multi_tc):
    """Images per grid step."""
    if B * per_image_bytes <= target_block_bytes:
        bt = B                                  # whole problem in one step
    else:
        bt = max(1, min(B, target_block_bytes // max(per_image_bytes, 1)))
    if multi_tc and B >= 2:
        # Only a multi-TensorCore part (v7x) benefits from >=2 grid steps;
        # on single-TC v5e/v6e extra steps are pure per-step overhead.
        bt = min(bt, max(1, B // 2))
    return bt


def channel_attention(x, w1, w2, *, target_block_bytes=None):
    """x: [B, C4, H, W] (NCHW), w1: [hid, C4], w2: [C4, hid]."""
    B, C4, H, W = x.shape
    HW = H * W
    hid = w1.shape[0]
    assert w1.shape == (hid, C4) and w2.shape == (C4, hid)

    multi_tc, vmem_cap = _device_info()
    if target_block_bytes is None:
        # Gains past ~6 MiB blocks are small (roofline plateaus ~85%); stay
        # conservative on v7x's 64 MiB VMEM, go a bit bigger on v5e/v6e.
        target_block_bytes = (6 << 20) if multi_tc else (12 << 20)

    # Lane-dense spatial axis: pad HW up to a multiple of 128 with zeros
    # (max path re-masks inside the kernel; sum is unaffected by zeros).
    HW_pad = ((HW + 127) // 128) * 128
    xr = x.reshape(B, C4, HW)
    if HW_pad != HW:
        xr = jnp.pad(xr, ((0, 0), (0, 0), (0, HW_pad - HW)))

    itemsize = x.dtype.itemsize
    per_image_bytes = C4 * HW_pad * itemsize
    Bt = _choose_bt(B, per_image_bytes, target_block_bytes, multi_tc)

    # Partial-last-block handling: pad the batch to a multiple of Bt instead
    # of shrinking Bt to a divisor of B (padded images are zeros, discarded).
    n_steps = -(-B // Bt)
    if multi_tc and n_steps > 1 and n_steps % 2:
        n_steps += 1                      # balanced 2-way core split on v7x
    B_pad = n_steps * Bt
    if B_pad != B:
        xr = jnp.pad(xr, ((0, B_pad - B), (0, 0), (0, 0)))

    w1t = jnp.transpose(w1)               # (C4, hid) — no in-kernel transpose
    w2t = jnp.transpose(w2)               # (hid, C4)

    # VMEM budget: double-buffered in/out, one extra full block (third input
    # buffer on v7x OR the possibly-materialized f32 scale broadcast), weights.
    block_bytes = Bt * per_image_bytes
    deep_buffer = multi_tc and n_steps > 1
    in_bufs = 3 if deep_buffer else 2
    extra_block = max(Bt * C4 * HW_pad * 4, block_bytes)
    w_bytes = (w1t.size + w2t.size) * w1t.dtype.itemsize
    vmem_limit = (in_bufs * block_bytes + 2 * block_bytes + extra_block
                  + 4 * w_bytes + (2 << 20))
    cap = (48 << 20) if multi_tc else min(96 << 20, max(vmem_cap - (16 << 20), 48 << 20))
    vmem_limit = int(min(max(vmem_limit, 32 << 20), cap))

    x_block = (Bt, C4, HW_pad)
    x_index = lambda b: (b, 0, 0)
    x_spec = pl.BlockSpec(x_block, x_index)
    if deep_buffer:
        try:
            # Third input buffer helps hide the serial pool->MLP->sigmoid
            # epilogue behind the faster v7x HBM stream; neutral elsewhere.
            x_spec = pl.BlockSpec(x_block, x_index, pipeline_mode=pl.Buffered(3))
        except Exception:
            x_spec = pl.BlockSpec(x_block, x_index)

    if multi_tc and n_steps > 1:
        # Only core_parallel actually changes codegen for the 2-TC split.
        sem = (getattr(pltpu, "CORE_PARALLEL", "parallel"),)
    else:
        sem = ("arbitrary",)

    out = pl.pallas_call(
        functools.partial(_ca_kernel, hw_valid=HW),
        out_shape=jax.ShapeDtypeStruct((B_pad, C4, HW_pad), x.dtype),
        grid_spec=pltpu.PrefetchScalarGridSpec(
            num_scalar_prefetch=0,
            grid=(n_steps,),
            in_specs=[
                x_spec,
                pl.BlockSpec((C4, hid), lambda b: (0, 0)),
                pl.BlockSpec((hid, C4), lambda b: (0, 0)),
            ],
            out_specs=pl.BlockSpec(x_block, x_index),
        ),
        compiler_params=pltpu.CompilerParams(
            dimension_semantics=sem,
            vmem_limit_bytes=vmem_limit,
        ),
    )(xr, w1t, w2t)

    out = out[:B, :, :HW]
    return out.reshape(B, C4, H, W)


def channel_attention_ref(x, w1, w2):
    # Pure-JAX reference mirroring the PyTorch forward.
    p_avg = jnp.mean(x, axis=(2, 3), keepdims=True)   # (B, C4, 1, 1)
    p_max = jnp.max(x, axis=(2, 3), keepdims=True)

    def mlp(p):  # 1x1 convs with no bias == matmul over the channel axis
        h = jnp.maximum(jnp.einsum('oc,bcuv->bouv', w1, p), 0.0)
        return jnp.einsum('co,bouv->bcuv', w2, h)

    return x * jax.nn.sigmoid(mlp(p_max) + mlp(p_avg))


if __name__ == "__main__":
    # channel=16, reduction=8  ->  hid=2, actual input channels C4=64
    channel, reduction = 16, 8
    hid = channel // reduction
    C4 = channel * 4
    B, H, W = 2, 16, 16   # HW = 256 -> already lane-dense (multiple of 128)

    key = jax.random.PRNGKey(0)
    kx, k1, k2 = jax.random.split(key, 3)
    x = jax.random.normal(kx, (B, C4, H, W), dtype=jnp.float32)
    # Conv2d(C4, hid, 1, bias=False).weight -> (hid, C4, 1, 1); squeezed to (hid, C4)
    w1 = 0.1 * jax.random.normal(k1, (hid, C4), dtype=jnp.float32)
    # Conv2d(hid, C4, 1, bias=False).weight -> (C4, hid, 1, 1); squeezed to (C4, hid)
    w2 = 0.1 * jax.random.normal(k2, (C4, hid), dtype=jnp.float32)

    out = channel_attention(x, w1, w2)
    out = jax.block_until_ready(out)

    ref = channel_attention_ref(x, w1, w2)
    assert out.shape == ref.shape
    assert jnp.allclose(out, ref, atol=1e-5, rtol=1e-5), "mismatch vs reference"

    print("KERNEL_OK")
</pallas_src>

<mosaic_0001>
module attributes {stable_mosaic.version = 11 : i64} {
  func.func @_ca_kernel(%arg0: i32, %arg1: memref<2x64x256xf32, #tpu.memory_space<vmem>>, %arg2: memref<64x2xf32, #tpu.memory_space<vmem>>, %arg3: memref<2x64xf32, #tpu.memory_space<vmem>>, %arg4: memref<2x64x256xf32, #tpu.memory_space<vmem>>) attributes {dimension_semantics = [#tpu.dimension_semantics<arbitrary>], iteration_bounds = array<i64: 1>, scalar_prefetch = 0 : i64, scratch_operands = 0 : i64, tpu.core_type = #tpu.core_type<tc>, window_params = [{transform_indices = @transform_0, window_bounds = array<i64: 2, 64, 256>}, {pipeline_mode = #tpu.pipeline_mode<synchronous>, transform_indices = @transform_1, window_bounds = array<i64: 64, 2>}, {pipeline_mode = #tpu.pipeline_mode<synchronous>, transform_indices = @transform_2, window_bounds = array<i64: 2, 64>}, {transform_indices = @transform_3, window_bounds = array<i64: 2, 64, 256>}]} {
    %c0 = arith.constant 0 : index
    %c0_0 = arith.constant 0 : index
    %c0_1 = arith.constant 0 : index
    %0 = vector.load %arg1[%c0, %c0_0, %c0_1] : memref<2x64x256xf32, #tpu.memory_space<vmem>>, vector<2x64x256xf32>
    %c0_2 = arith.constant 0 : index
    %c0_3 = arith.constant 0 : index
    %1 = vector.load %arg2[%c0_2, %c0_3] : memref<64x2xf32, #tpu.memory_space<vmem>>, vector<64x2xf32>
    %c0_4 = arith.constant 0 : index
    %c0_5 = arith.constant 0 : index
    %2 = vector.load %arg3[%c0_4, %c0_5] : memref<2x64xf32, #tpu.memory_space<vmem>>, vector<2x64xf32>
    %cst = arith.constant dense<0.000000e+00> : vector<2x64xf32>
    %3 = vector.multi_reduction <add>, %0, %cst [2] : vector<2x64x256xf32> to vector<2x64xf32>
    %cst_6 = arith.constant 3.906250e-03 : f32
    %4 = vector.broadcast %cst_6 : f32 to vector<2x64xf32>
    %5 = arith.mulf %3, %4 : vector<2x64xf32>
    %cst_7 = arith.constant dense<0xFF800000> : vector<2x64xf32>
    %6 = vector.multi_reduction <maximumf>, %0, %cst_7 [2] : vector<2x64x256xf32> to vector<2x64xf32>
    %7 = tpu.concatenate %6, %5 in 0 : vector<2x64xf32>, vector<2x64xf32> -> vector<4x64xf32>
    %cst_8 = arith.constant dense<0.000000e+00> : vector<4x2xf32>
    %8 = tpu.matmul %7, %1, %cst_8 {dimension_numbers = #tpu.dot_dimension_numbers<[1], [0], [0], [1], [0, 0, 1, 1], [], []>} : vector<4x64xf32>, vector<64x2xf32>, vector<4x2xf32> -> vector<4x2xf32>
    %cst_9 = arith.constant 0.000000e+00 : f32
    %9 = vector.broadcast %cst_9 : f32 to vector<4x2xf32>
    %10 = arith.maximumf %8, %9 : vector<4x2xf32>
    %11 = vector.extract_strided_slice %10 {offsets = [0, 0], sizes = [2, 2], strides = [1, 1]} : vector<4x2xf32> to vector<2x2xf32>
    %12 = vector.extract_strided_slice %10 {offsets = [2, 0], sizes = [2, 2], strides = [1, 1]} : vector<4x2xf32> to vector<2x2xf32>
    %13 = arith.addf %11, %12 : vector<2x2xf32>
    %cst_10 = arith.constant dense<0.000000e+00> : vector<2x64xf32>
    %14 = tpu.matmul %13, %2, %cst_10 {dimension_numbers = #tpu.dot_dimension_numbers<[1], [0], [0], [1], [0, 0, 1, 1], [], []>} : vector<2x2xf32>, vector<2x64xf32>, vector<2x64xf32> -> vector<2x64xf32>
    %15 = arith.negf %14 : vector<2x64xf32>
    %16 = math.exp %15 : vector<2x64xf32>
    %cst_11 = arith.constant 1.000000e+00 : f32
    %17 = vector.broadcast %cst_11 : f32 to vector<2x64xf32>
    %18 = arith.addf %17, %16 : vector<2x64xf32>
    %19 = arith.divf %17, %18 : vector<2x64xf32>
    %20 = vector.shape_cast %19 : vector<2x64xf32> to vector<2x64x1xf32>
    %21 = vector.broadcast %20 : vector<2x64x1xf32> to vector<2x64x256xf32>
    %22 = arith.mulf %0, %21 : vector<2x64x256xf32>
    %c0_12 = arith.constant 0 : index
    %c0_13 = arith.constant 0 : index
    %c0_14 = arith.constant 0 : index
    %23 = vector.load %arg4[%c0_12, %c0_13, %c0_14] : memref<2x64x256xf32, #tpu.memory_space<vmem>>, vector<2x64x256xf32>
    tpu.vector_store %arg4[%c0_12, %c0_13, %c0_14], %22 {strides = array<i32>} : memref<2x64x256xf32, #tpu.memory_space<vmem>>, vector<2x64x256xf32>,
    return
  }
  func.func @transform_0(%arg0: i32) -> (i32, i32, i32) {
    %c0_i32 = arith.constant 0 : i32
    %c0_i32_0 = arith.constant 0 : i32
    %c0_i32_1 = arith.constant 0 : i32
    return %arg0, %c0_i32, %c0_i32_0 : i32, i32, i32
  }
  func.func @transform_1(%arg0: i32) -> (i32, i32) {
    %c0_i32 = arith.constant 0 : i32
    %c0_i32_0 = arith.constant 0 : i32
    %c0_i32_1 = arith.constant 0 : i32
    return %c0_i32, %c0_i32_0 : i32, i32
  }
  func.func @transform_2(%arg0: i32) -> (i32, i32) {
    %c0_i32 = arith.constant 0 : i32
    %c0_i32_0 = arith.constant 0 : i32
    %c0_i32_1 = arith.constant 0 : i32
    return %c0_i32, %c0_i32_0 : i32, i32
  }
  func.func @transform_3(%arg0: i32) -> (i32, i32, i32) {
    %c0_i32 = arith.constant 0 : i32
    %c0_i32_0 = arith.constant 0 : i32
    %c0_i32_1 = arith.constant 0 : i32
    return %arg0, %c0_i32, %c0_i32_0 : i32, i32, i32
  }
}

</mosaic_0001>

<bundles_post_ra>
// kernel: tpu_custom_call.1
= control target key start
LH: loop header
LB: loop body
LE: loop exit
PB: predicated region body
PF: predicated region fallthrough
CT: control target
= control target key end

     0   :  { %8 = vsyncpa [#allocation3], 0  ;;  %s1145_s0 = inlined_call_operand.hbm [shape: f32[2,64,256], index: 0, kind: input, shape index: {}]   ;;  %s1146_s1 = inlined_call_operand.vmem [shape: f32[64,2], index: 1, kind: input, shape index: {}]   ;;  %s1147_s2 = inlined_call_operand.vmem [shape: f32[2,64], index: 2, kind: input, shape index: {}]   ;;  %s1148_s3 = inlined_call_operand.hbm [shape: f32[2,64,256], index: 3, kind: output, shape index: {}]  }
   0x1   :  { %9 = vsyncpa [#allocation4], 0  ;;  %s800_s12 = smov [#allocation2]  }
   0x2   :  { %s15_s13 = sshll.u32 %s800_s12, 4  ;;  %s16_s13 = int_to_ptr.vmem [resolvable:$true] %s15_s13 }
   0x3   :  { %s764_s14 = scalar_lea.vmem %s16_s13, 4096  ;;  %p769_p1 = scmp.lt.s32.totalorder %s16_s13, %s16_s13 }
   0x4   :  { %p765_p0 = scmp.ne.s32.totalorder %s16_s13, %s764_s14  ;;  %p770_p2 = scmp.lt.s32.totalorder %s764_s14, %s764_s14 }
   0x6   :  { %p771_p3 = por %p770_p2, %p769_p1 }
   0x8   :  { %p772_p4 = pnand %p771_p3, %p765_p0 }
   0xa   :  { %775 = shalt.err (!%p772_p4)
}
   0xb   :  { %s801_s15 = smov 256   ;;  %s802_s16 = smov 16  }
   0xc   :  { %21 = dma.hbm_to_vmem [thread:$0]  %s1145_s0, 4096, %s16_s13, [#allocation3], %s801_s15, %s801_s15, %s802_s16  }
   0xd   :  { %796 = dma.done.wait [#allocation3], 4096  }
   0xe   :  { %797 = vsyncadd [#allocation3], 4294963200  ;;  %v832_v0 = vld [vmem:[#allocation2 + $0x80] sm:$0xff]  ;;  %v834_v1 = vld [vmem:[#allocation2 + $0x88] sm:$0xff]  ;;  %vm804_vm0 = vmmov 0   ;;  %vm209_vm1 = vcmask 130112  }
   0xf   :  { %v836_v2 = vld [vmem:[#allocation2] sm:$0xff]  ;;  %v94_v3 = vadd.f32 %v834_v1, %v832_v0  ;;  %v840_v4 = vld [vmem:[#allocation2 + $0x8] sm:$0xff]  ;;  %v842_v5 = vld [vmem:[#allocation2 + $0x90] sm:$0xff]  ;;  %v158_v27 = vmax.f32 %v832_v0, %v834_v1  ;;  %vm216_vm2 = vcmask 195712   ;;  %vm223_vm3 = vcmask 261312  }
  0x10   :  { %1162 = vst [vmem:[#allocation8_spill] sm:$0xff] %v842_v5  ;;  %v844_v6 = vld [vmem:[#allocation2 + $0x98] sm:$0xff]  ;;  %v70_v7 = vadd.f32 %v840_v4, %v836_v2  ;;  %v848_v8 = vld [vmem:[#allocation2 + $0x10] sm:$0xff]  ;;  %v856_v12 = vld [vmem:[#allocation2 + $0xa0] sm:$0xff]  ;;  %v134_v25 = vmax.f32 %v836_v2, %v840_v4  ;;  %vm230_vm4 = vcmask 326912   ;;  %vm237_vm5 = vcmask 392512  }
  0x11   :  { %1163 = vst [vmem:[#allocation9_spill] sm:$0xff] %v844_v6  ;;  %v850_v9 = vld [vmem:[#allocation2 + $0x18] sm:$0xff]  ;;  %95 = vadd.xlane.f32.xlu1 %v94_v3  ;;  %v97_v10 = vadd.f32 %v844_v6, %v842_v5  ;;  %v858_v13 = vld [vmem:[#allocation2 + $0xa8] sm:$0xff]  ;;  %v860_v14 = vld [vmem:[#allocation2 + $0x20] sm:$0xff]  ;;  %v161_v26 = vmax.f32 %v842_v5, %v844_v6  ;;  %v803_v3 = vmov 0.0   ;;  %vm244_vm6 = vcmask 458112  }
  0x12   :  { %71 = vadd.xlane.f32.xlu0 %v70_v7  ;;  %v73_v11 = vadd.f32 %v850_v9, %v848_v8  ;;  %1164 = vst [vmem:[#allocation10_spill] sm:$0xff] %v858_v13  ;;  %v862_v15 = vld [vmem:[#allocation2 + $0x28] sm:$0xff]  ;;  %v100_v16 = vadd.f32 %v858_v13, %v856_v12  ;;  %v868_v18 = vld [vmem:[#allocation2 + $0xb0] sm:$0xff]  ;;  %v870_v19 = vld [vmem:[#allocation2 + $0xb8] sm:$0xff]  ;;  %v137_v24 = vmax.f32 %v848_v8, %v850_v9  ;;  %vm251_vm7 = vcmask 523712  }
  0x13   :  { %v76_v17 = vadd.f32 %v862_v15, %v860_v14  ;;  %1165 = vst [vmem:[#allocation11_spill] sm:$0xff] %v868_v18  ;;  %1166 = vst [vmem:[#allocation12_spill] sm:$0xff] %v870_v19  ;;  %v872_v20 = vld [vmem:[#allocation2 + $0x30] sm:$0xff]  ;;  %v874_v21 = vld [vmem:[#allocation2 + $0x38] sm:$0xff]  ;;  %v103_v22 = vadd.f32 %v870_v19, %v868_v18  ;;  %v164_v34 = vmax.f32 %v856_v12, %v858_v13  ;;  %722 = vmatprep.subr.mxu0 %v803_v3  ;;  %vm292_vm8 = vcmask 1041409  }
  0x14   :  { %v79_v23 = vadd.f32 %v874_v21, %v872_v20  ;;  %v888_v28 = vld [vmem:[#allocation2 + $0xc0] sm:$0xff]  ;;  %v890_v29 = vld [vmem:[#allocation2 + $0xc8] sm:$0xff]  ;;  %v140_v35 = vmax.f32 %v860_v14, %v862_v15  ;;  %v904_v36 = vld [vmem:[#allocation2 + $0xd0] sm:$0xff]  ;;  %v167_v42 = vmax.f32 %v868_v18, %v870_v19  ;;  %v143_v43 = vmax.f32 %v872_v20, %v874_v21  ;;  %741 = vmatprep.subr.mxu1 %v803_v3 }
  0x15   :  { %98 = vadd.xlane.f32.xlu1 %v97_v10  ;;  %1167 = vst [vmem:[#allocation13_spill] sm:$0xff] %v888_v28  ;;  %1168 = vst [vmem:[#allocation14_spill] sm:$0xff] %v890_v29  ;;  %v892_v30 = vld [vmem:[#allocation2 + $0x40] sm:$0xff]  ;;  %v894_v31 = vld [vmem:[#allocation2 + $0x48] sm:$0xff]  ;;  %v106_v32 = vadd.f32 %v890_v29, %v888_v28  ;;  %v170_v50 = vmax.f32 %v888_v28, %v890_v29  ;;  %738 = vmatprep.mubr.msk.f32.mxu0 %vm804_vm0, %v803_v3  ;;  %vm389_vm9 = vcmask 1043459   ;;  %vm392_vm10 = vcmask 1041408  }
  0x16   :  { %74 = vadd.xlane.f32.xlu0 %v73_v11  ;;  %v82_v33 = vadd.f32 %v894_v31, %v892_v30  ;;  %1169 = vst [vmem:[#allocation15_spill] sm:$0xff] %v904_v36  ;;  %v906_v37 = vld [vmem:[#allocation2 + $0xd8] sm:$0xff]  ;;  %v908_v38 = vld [vmem:[#allocation2 + $0x50] sm:$0xff]  ;;  %v920_v44 = vld [vmem:[#allocation2 + $0xe0] sm:$0xff]  ;;  %v146_v51 = vmax.f32 %v892_v30, %v894_v31  ;;  %743 = vmatprep.mubr.msk.f32.mxu1 %vm804_vm0, %v803_v3  ;;  %vm394_vm11 = vcmask 523264   ;;  %vm473_vm12 = vcmask 15360  }
  0x17   :  { %1170 = vst [vmem:[#allocation16_spill] sm:$0xff] %v906_v37  ;;  %v910_v39 = vld [vmem:[#allocation2 + $0x58] sm:$0xff]  ;;  %v109_v40 = vadd.f32 %v906_v37, %v904_v36  ;;  %1171 = vst [vmem:[#allocation17_spill] sm:$0xff] %v920_v44  ;;  %v922_v45 = vld [vmem:[#allocation2 + $0xe8] sm:$0xff]  ;;  %v173_v58 = vmax.f32 %v904_v36, %v906_v37 }
  0x18   :  { %v85_v41 = vadd.f32 %v910_v39, %v908_v38  ;;  %1172 = vst [vmem:[#allocation18_spill] sm:$0xff] %v922_v45  ;;  %v924_v46 = vld [vmem:[#allocation2 + $0x60] sm:$0xff]  ;;  %v926_v47 = vld [vmem:[#allocation2 + $0x68] sm:$0xff]  ;;  %v112_v48 = vadd.f32 %v922_v45, %v920_v44  ;;  %v936_v52 = vld [vmem:[#allocation2 + $0xf0] sm:$0xff]  ;;  %v149_v59 = vmax.f32 %v908_v38, %v910_v39  ;;  %v176_v60 = vmax.f32 %v920_v44, %v922_v45 }
  0x19   :  { %101 = vadd.xlane.f32.xlu1 %v100_v16  ;;  %v88_v49 = vadd.f32 %v926_v47, %v924_v46  ;;  %1173 = vst [vmem:[#allocation19_spill] sm:$0xff] %v936_v52  ;;  %v938_v53 = vld [vmem:[#allocation2 + $0xf8] sm:$0xff]  ;;  %v940_v54 = vld [vmem:[#allocation2 + $0x70] sm:$0xff]  ;;  %v152_v61 = vmax.f32 %v924_v46, %v926_v47  ;;  %v66_v11 = vld [vmem:[%s1146_s1 + $0x28] sm:$0xff] }
  0x1a   :  { %77 = vadd.xlane.f32.xlu0 %v76_v17  ;;  %1174 = vst [vmem:[#allocation20_spill] sm:$0xff] %v938_v53  ;;  %v942_v55 = vld [vmem:[#allocation2 + $0x78] sm:$0xff]  ;;  %v115_v56 = vadd.f32 %v938_v53, %v936_v52  ;;  %v179_v62 = vmax.f32 %v936_v52, %v938_v53  ;;  %v67_v10 = vld [vmem:[%s1146_s1 + $0x30] sm:$0xff]  ;;  %v65_v16 = vld [vmem:[%s1146_s1 + $0x20] sm:$0xff] }
  0x1b   :  { %v91_v57 = vadd.f32 %v942_v55, %v940_v54  ;;  %v155_v63 = vmax.f32 %v940_v54, %v942_v55  ;;  %v68_v7 = vld [vmem:[%s1146_s1 + $0x38] sm:$0xff] }
  0x1c   :  { %723 = vmatpush3.msra.mxu0 %v68_v7  ;;  %v64_v17 = vld [vmem:[%s1146_s1 + $0x18] sm:$0xff] }
  0x1d   :  { %104 = vadd.xlane.f32.xlu1 %v103_v22  ;;  %724 = vmatprep.subr.mxu0 %v803_v3  ;;  %v63_v22 = vld [vmem:[%s1146_s1 + $0x10] sm:$0xff] }
  0x1e   :  { %80 = vadd.xlane.f32.xlu0 %v79_v23  ;;  %725 = vmatpush3.msra.mxu0 %v67_v10  ;;  %v62_v23 = vld [vmem:[%s1146_s1 + $0x8] sm:$0xff] }
  0x1f   :  { %726 = vmatprep.subr.mxu0 %v803_v3 }
  0x20   :  { %727 = vmatpush3.msra.mxu0 %v66_v11 }
  0x21   :  { %138 = vmax.xlane.f32.xlu1 %v137_v24  ;;  %728 = vmatprep.subr.mxu0 %v803_v3  ;;  %v61_v24 = vld [vmem:[%s1146_s1] sm:$0xff] }
  0x22   :  { %135 = vmax.xlane.f32.xlu0 %v134_v25  ;;  %729 = vmatpush3.msra.mxu0 %v65_v16 }
  0x23   :  { %730 = vmatprep.subr.mxu0 %v803_v3 }
  0x24   :  { %731 = vmatpush3.msra.mxu0 %v64_v17 }
  0x25   :  { %162 = vmax.xlane.f32.xlu1 %v161_v26  ;;  %732 = vmatprep.subr.mxu0 %v803_v3 }
  0x26   :  { %159 = vmax.xlane.f32.xlu0 %v158_v27  ;;  %733 = vmatpush3.msra.mxu0 %v63_v22 }
  0x27   :  { %734 = vmatprep.subr.mxu0 %v803_v3 }
  0x28   :  { %735 = vmatpush3.msra.mxu0 %v62_v23 }
  0x29   :  { %107 = vadd.xlane.f32.xlu1 %v106_v32  ;;  %736 = vmatprep.subr.mxu0 %v803_v3 }
  0x2a   :  { %83 = vadd.xlane.f32.xlu0 %v82_v33  ;;  %737 = vmatpush3.msra.mxu0 %v61_v24 }
  0x2d   :  { %165 = vmax.xlane.f32.xlu1 %v164_v34 }
  0x2e   :  { %141 = vmax.xlane.f32.xlu0 %v140_v35 }
  0x31   :  { %110 = vadd.xlane.f32.xlu1 %v109_v40 }
  0x32   :  { %86 = vadd.xlane.f32.xlu0 %v85_v41 }
  0x35   :  { %168 = vmax.xlane.f32.xlu1 %v167_v42 }
  0x36   :  { %144 = vmax.xlane.f32.xlu0 %v143_v43 }
  0x39   :  { %113 = vadd.xlane.f32.xlu1 %v112_v48 }
  0x3a   :  { %89 = vadd.xlane.f32.xlu0 %v88_v49 }
  0x3d   :  { %171 = vmax.xlane.f32.xlu1 %v170_v50 }
  0x3e   :  { %147 = vmax.xlane.f32.xlu0 %v146_v51 }
  0x41   :  { %116 = vadd.xlane.f32.xlu1 %v115_v56 }
  0x42   :  { %92 = vadd.xlane.f32.xlu0 %v91_v57  ;;  %v198_v57 = vlaneseq }
  0x45   :  { %174 = vmax.xlane.f32.xlu1 %v173_v58 }
  0x46   :  { %150 = vmax.xlane.f32.xlu0 %v149_v59 }
  0x49   :  { %177 = vmax.xlane.f32.xlu1 %v176_v60  ;;  %v199_v60 = vand.u32 127, %v198_v57 }
  0x4a   :  { %153 = vmax.xlane.f32.xlu0 %v152_v61  ;;  %v996_v61 = vshrl.u32 %v198_v57, 7 }
  0x4b   :  { %v211_v3 = vadd.s32 4294967280, %v199_v60  ;;  %v218_v10 = vadd.s32 4294967272, %v199_v60  ;;  %v225_v53 = vadd.s32 4294967264, %v199_v60  ;;  %v232_v52 = vadd.s32 4294967256, %v199_v60 }
  0x4c   :  { %v1003_v11 = vsub.s32 %v199_v60, %v996_v61  ;;  %v239_v44 = vadd.s32 4294967248, %v199_v60 }
  0x4d   :  { %180 = vmax.xlane.f32.xlu1 %v179_v62  ;;  %v1009_v23 = vsub.s32 %v211_v3, %v996_v61  ;;  %v1012_v45 = vsub.s32 %v218_v10, %v996_v61 }
  0x4e   :  { %156 = vmax.xlane.f32.xlu0 %v155_v63  ;;  %v204_v63 = vadd.s32 4294967288, %v199_v60 }
  0x50   :  { %v1006_v17 = vsub.s32 %v204_v63, %v996_v61 }
  0x9a   :  { %v96_v25 = vpop.xlane.xlu1 %95 }
  0x9b   :  { %v72_v26 = vpop.xlane.xlu0 %71  ;;  %v126_v37 = vmul.f32 0.00390625, %v96_v25 }
  0x9c   :  { %v118_v19 = vmul.f32 0.00390625, %v72_v26  ;;  %v1024_v26 = vsub.s32 %v232_v52, %v996_v61 }
  0x9e   :  { %v99_v27 = vpop.xlane.xlu1 %98 }
  0x9f   :  { %v75_v32 = vpop.xlane.xlu0 %74  ;;  %v127_v22 = vmul.f32 0.00390625, %v99_v27  ;;  %v246_v27 = vadd.s32 4294967240, %v199_v60 }
  0xa0   :  { %v119_v57 = vmul.f32 0.00390625, %v75_v32 }
  0xa1   :  { %v357_v3 = vrot.slane %v127_v22, %v1006_v17  ;;  %v1029_v22 = vsub.s32 %v239_v44, %v996_v61 }
  0xa2   :  { %v102_v33 = vpop.xlane.xlu1 %101  ;;  %v318_v25 = vrot.slane %v119_v57, %v1006_v17 }
  0xa3   :  { %v78_v34 = vpop.xlane.xlu0 %77  ;;  %v128_v36 = vmul.f32 0.00390625, %v102_v33  ;;  %v1021_v33 = vsub.s32 %v225_v53, %v996_v61  ;;  %v1035_v53 = vsub.s32 %v246_v27, %v996_v61 }
  0xa4   :  { %v120_v18 = vmul.f32 0.00390625, %v78_v34  ;;  %v353_v34 = vrot.slane %v126_v37, %v1003_v11 }
  0xa6   :  { %v105_v35 = vpop.xlane.xlu1 %104  ;;  %v323_v6 = vrot.slane %v120_v18, %v1009_v23 }
  0xa7   :  { %v81_v40 = vpop.xlane.xlu0 %80  ;;  %v129_v63 = vmul.f32 0.00390625, %v105_v35  ;;  %v362_v35 = vrot.slane %v128_v36, %v1009_v23 }
  0xa8   :  { %v121_v28 = vmul.f32 0.00390625, %v81_v40  ;;  %v314_v40 = vrot.slane %v118_v19, %v1003_v11 }
  0xa9   :  { %v367_v57 = vrot.slane %v129_v63, %v1012_v45 }
  0xaa   :  { %v984_v41 = vpop.xlane.xlu1 %138  ;;  %v328_v37 = vrot.slane %v121_v28, %v1012_v45  ;;  %v319_v18 = vsel %vm209_vm1, %v318_v25, %v314_v40 }
  0xab   :  { %v986_v42 = vpop.xlane.xlu0 %135  ;;  %v208_v36 = vrot.slane %v984_v41, %v1006_v17 }
  0xac   :  { %v203_v44 = vrot.slane %v986_v42, %v1003_v11  ;;  %v324_v42 = vsel %vm216_vm2, %v323_v6, %v319_v18 }
  0xae   :  { %v988_v43 = vpop.xlane.xlu1 %162 }
  0xaf   :  { %v990_v48 = vpop.xlane.xlu0 %159 }
  0xb0   :  { %v256_v63 = vrot.slane %v990_v48, %v1003_v11  ;;  %v210_v48 = vsel %vm209_vm1, %v208_v36, %v203_v44 }
  0xb2   :  { %v108_v49 = vpop.xlane.xlu1 %107 }
  0xb3   :  { %v84_v50 = vpop.xlane.xlu0 %83  ;;  %v130_v10 = vmul.f32 0.00390625, %v108_v49  ;;  %v358_v49 = vsel %vm209_vm1, %v357_v3, %v353_v34 }
  0xb4   :  { %v122_v60 = vmul.f32 0.00390625, %v84_v50  ;;  %v260_v50 = vrot.slane %v988_v43, %v1006_v17  ;;  %v363_v28 = vsel %vm216_vm2, %v362_v35, %v358_v49  ;;  %v329_v43 = vsel %vm223_vm3, %v328_v37, %v324_v42 }
  0xb5   :  { %v372_v27 = vrot.slane %v130_v10, %v1021_v33  ;;  %v368_v5 = vsel %vm223_vm3, %v367_v57, %v363_v28 }
  0xb6   :  { %v992_v51 = vpop.xlane.xlu1 %165  ;;  %v333_v41 = vrot.slane %v122_v60, %v1021_v33  ;;  %v261_v35 = vsel %vm209_vm1, %v260_v50, %v256_v63 }
  0xb7   :  { %v994_v56 = vpop.xlane.xlu0 %141  ;;  %v265_v11 = vrot.slane %v992_v51, %v1009_v23 }
  0xb8   :  { %v215_v6 = vrot.slane %v994_v56, %v1009_v23 }
  0xb9   :  { %v266_v49 = vsel %vm216_vm2, %v265_v11, %v261_v35 }
  0xba   :  { %v111_v58 = vpop.xlane.xlu1 %110 }
  0xbb   :  { %v87_v59 = vpop.xlane.xlu0 %86  ;;  %v131_v3 = vmul.f32 0.00390625, %v111_v58  ;;  %v373_v58 = vsel %vm230_vm4, %v372_v27, %v368_v5 }
  0xbc   :  { %v123_v34 = vmul.f32 0.00390625, %v87_v59 }
  0xbe   :  { %v998_v62 = vpop.xlane.xlu1 %168  ;;  %v338_v60 = vrot.slane %v123_v34, %v1024_v26 }
  0xbf   :  { %v1000_v7 = vpop.xlane.xlu0 %144  ;;  %v270_v51 = vrot.slane %v998_v62, %v1012_v45 }
  0xc0   :  { %v222_v57 = vrot.slane %v1000_v7, %v1012_v45  ;;  %v217_v45 = vsel %vm216_vm2, %v215_v6, %v210_v48 }
  0xc1   :  { %v271_v63 = vsel %vm223_vm3, %v270_v51, %v266_v49  ;;  %v558_v49 = vsub.s32 0, %v996_v61 }
  0xc2   :  { %v114_v16 = vpop.xlane.xlu1 %113 }
  0xc3   :  { %v90_v24 = vpop.xlane.xlu0 %89  ;;  %v132_v25 = vmul.f32 0.00390625, %v114_v16  ;;  %v334_v16 = vsel %vm230_vm4, %v333_v41, %v329_v43 }
  0xc4   :  { %v124_v40 = vmul.f32 0.00390625, %v90_v24  ;;  %v377_v24 = vrot.slane %v131_v3, %v1024_v26  ;;  %v339_v50 = vsel %vm237_vm5, %v338_v60, %v334_v16 }
  0xc5   :  { %v382_v5 = vrot.slane %v132_v25, %v1029_v22 }
  0xc6   :  { %v1014_v29 = vpop.xlane.xlu1 %171 }
  0xc7   :  { %v1017_v32 = vpop.xlane.xlu0 %147  ;;  %v275_v56 = vrot.slane %v1014_v29, %v1021_v33  ;;  %v378_v29 = vsel %vm237_vm5, %v377_v24, %v373_v58 }
  0xc8   :  { %v229_v37 = vrot.slane %v1017_v32, %v1021_v33  ;;  %v224_v33 = vsel %vm223_vm3, %v222_v57, %v217_v45 }
  0xc9   :  { %v276_v28 = vsel %vm230_vm4, %v275_v56, %v271_v63 }
  0xca   :  { %v117_v52 = vpop.xlane.xlu1 %116 }
  0xcb   :  { %v93_v19 = vpop.xlane.xlu0 %92  ;;  %v133_v17 = vmul.f32 0.00390625, %v117_v52  ;;  %v343_v52 = vrot.slane %v124_v40, %v1029_v22 }
  0xcc   :  { %v125_v59 = vmul.f32 0.00390625, %v93_v19 }
  0xcd   :  { %v387_v36 = vrot.slane %v133_v17, %v1035_v53  ;;  %v344_v27 = vsel %vm244_vm6, %v343_v52, %v339_v50 }
  0xce   :  { %v175_v13 = vpop.xlane.xlu1 %174  ;;  %v348_v7 = vrot.slane %v125_v59, %v1035_v53  ;;  %v69_v59 = vld [vmem:[%s1147_s2] sm:$0x3]  ;;  %s805_s2 = smov [#allocation5]  }
  0xcf   :  { %v151_v10 = vpop.xlane.xlu0 %150  ;;  %v280_v62 = vrot.slane %v175_v13, %v1024_v26  ;;  %v383_v13 = vsel %vm244_vm6, %v382_v5, %v378_v29  ;;  %742 = vmatpush3.msk.msra.mxu1 %vm392_vm10, %v69_v59  ;;  %s695_s8 = sshll.u32 %s805_s2, 4  ;;  %s696_s8 = int_to_ptr.vmem [resolvable:$true] %s695_s8 }
  0xd0   :  { %v236_v19 = vrot.slane %v151_v10, %v1024_v26  ;;  %v231_v26 = vsel %vm230_vm4, %v229_v37, %v224_v33  ;;  %v388_v3 = vsel %vm251_vm7, %v387_v36, %v383_v13  ;;  %s776_s9 = scalar_lea.vmem %s696_s8, 4096  ;;  %p781_p6 = scmp.lt.s32.totalorder %s696_s8, %s696_s8 }
  0xd1   :  { %v281_v34 = vsel %vm237_vm5, %v280_v62, %v276_v28  ;;  %v593_v62 = vsub.s32 1, %v996_v61  ;;  %p777_p5 = scmp.ne.s32.totalorder %s696_s8, %s776_s9  ;;  %p782_p7 = scmp.lt.s32.totalorder %s776_s9, %s776_s9 }
  0xd2   :  { %v178_v23 = vpop.xlane.xlu1 %177  ;;  %v238_v40 = vsel %vm237_vm5, %v236_v19, %v231_v26 }
  0xd3   :  { %v154_v44 = vpop.xlane.xlu0 %153  ;;  %v285_v18 = vrot.slane %v178_v23, %v1029_v22  ;;  %p783_p8 = por %p782_p7, %p781_p6 }
  0xd4   :  { %v243_v32 = vrot.slane %v154_v44, %v1029_v22  ;;  %v349_v22 = vsel %vm251_vm7, %v348_v7, %v344_v27 }
  0xd5   :  { %v286_v43 = vsel %vm244_vm6, %v285_v18, %v281_v34  ;;  %v390_v58 = vsel %vm389_vm9, %v388_v3, %v349_v22  ;;  %v1177_v22 = vld [vmem:[#allocation9_spill] sm:$0xff]  ;;  %p784_p9 = pnand %p783_p8, %p777_p5 }
  0xd6   :  { %v181_v41 = vpop.xlane.xlu1 %180  ;;  %v245_v11 = vsel %vm244_vm6, %v243_v32, %v238_v40 }
  0xd7   :  { %v290_v42 = vrot.slane %v181_v41, %v1035_v53  ;;  %v157_v25 = vpop.xlane.xlu0 %156 }
  0xd8   :  { %v250_v48 = vrot.slane %v157_v25, %v1035_v53 }
  0xd9   :  { %v291_v17 = vsel %vm251_vm7, %v290_v42, %v286_v43  ;;  %v1175_v42 = vld [vmem:[#allocation10_spill] sm:$0xff]  ;;  %v1178_v43 = vld [vmem:[#allocation13_spill] sm:$0xff] }
  0xda   :  { %v252_v10 = vsel %vm251_vm7, %v250_v48, %v245_v11  ;;  %v1179_v11 = vld [vmem:[#allocation14_spill] sm:$0xff] }
  0xdb   :  { %v293_v35 = vsel %vm292_vm8, %v291_v17, %v252_v10  ;;  %v1180_v17 = vld [vmem:[#allocation11_spill] sm:$0xff] }
  0xdc   :  { %v393_v6 = vsel %vm392_vm10, %v293_v35, %v390_v58  ;;  %v1181_v35 = vld [vmem:[#allocation12_spill] sm:$0xff] }
  0xdd   :  { %739 = vmatmul.mubr.msk.f32.vlgmr.msra.gmra.mxu0 %vm394_vm11, %v393_v6  ;;  %v1182_v6 = vld [vmem:[#allocation17_spill] sm:$0xff] }
 0x19d   :  { %v464_v53 = vpop.f32.mrf.mxu0 }
 0x19e   :  { %v468_v16 = vmax.f32 %v464_v53, 0.0  ;;  %v1183_v53 = vld [vmem:[#allocation18_spill] sm:$0xff] }
 0x19f   :  { %v740_v24 = vpop.f32.mrf.mxu0 }
 0x1a0   :  { %v470_v60 = vrot.slane %v468_v16, 2 }
 0x1a2   :  { %v472_v51 = vadd.f32 %v470_v60, %v468_v16  ;;  %v1184_v60 = vld [vmem:[#allocation15_spill] sm:$0xff] }
 0x1a4   :  { %744 = vmatmul.mubr.msk.f32.vlgmr.msra.gmra.mxu1 %vm473_vm12, %v472_v51 }
 0x264   :  { %v546_v57 = vpop.f32.mrf.mxu1 }
 0x265   :  { %v710_v5 = vmul.f32 -1.442695, %v546_v57  ;;  %v1185_v57 = vld [vmem:[#allocation16_spill] sm:$0xff] }
 0x266   :  { %v745_v52 = vpop.f32.mrf.mxu1 }
 0x267   :  { %752 = vpow2.f32 %v710_v5 }
 0x274   :  { %v753_v56 = vpop.eup %752 }
 0x275   :  { %v553_v23 = vadd.f32 1.0, %v753_v56  ;;  %v1186_v56 = vld [vmem:[#allocation19_spill] sm:$0xff] }
 0x277   :  { %754 = vrcp.f32 %v553_v23 }
 0x284   :  { %v755_v37 = vpop.eup %754 }
 0x285   :  { %v559_v36 = vrot.slane %v755_v37, %v558_v49  ;;  %v594_v44 = vrot.slane %v755_v37, %v593_v62  ;;  %v1187_v49 = vld [vmem:[#allocation20_spill] sm:$0xff] }
 0x287   :  { %565 = vbcast.lane.b32.xlu1 %v559_v36, 264  ;;  %561 = vbcast.lane.b32.xlu0 %v559_v36, 256 }
 0x28b   :  { %569 = vbcast.lane.b32.xlu1 %v559_v36, 272  ;;  %577 = vbcast.lane.b32.xlu0 %v559_v36, 288 }
 0x28f   :  { %573 = vbcast.lane.b32.xlu1 %v559_v36, 280  ;;  %585 = vbcast.lane.b32.xlu0 %v559_v36, 304 }
 0x293   :  { %581 = vbcast.lane.b32.xlu1 %v559_v36, 296  ;;  %596 = vbcast.lane.b32.xlu0 %v594_v44, 256 }
 0x297   :  { %589 = vbcast.lane.b32.xlu1 %v559_v36, 312  ;;  %604 = vbcast.lane.b32.xlu0 %v594_v44, 272 }
 0x29b   :  { %600 = vbcast.lane.b32.xlu1 %v594_v44, 264  ;;  %612 = vbcast.lane.b32.xlu0 %v594_v44, 288 }
 0x29f   :  { %608 = vbcast.lane.b32.xlu1 %v594_v44, 280  ;;  %620 = vbcast.lane.b32.xlu0 %v594_v44, 304 }
 0x2a3   :  { %616 = vbcast.lane.b32.xlu1 %v594_v44, 296 }
 0x2a7   :  { %624 = vbcast.lane.b32.xlu1 %v594_v44, 312 }
 0x2f9   :  { %v566_v45 = vpop.permute.xlu1 %565  ;;  %v562_v7 = vpop.permute.xlu0 %561 }
 0x2fa   :  { %v628_v19 = vmul.f32 %v566_v45, %v848_v8  ;;  %v629_v18 = vmul.f32 %v566_v45, %v850_v9  ;;  %v626_v61 = vmul.f32 %v562_v7, %v836_v2  ;;  %v627_v29 = vmul.f32 %v562_v7, %v840_v4 }
 0x2fc   :  { %660 = vst [vmem:[#allocation5 + $0x10] sm:$0xff] %v628_v19  ;;  %661 = vst [vmem:[#allocation5 + $0x18] sm:$0xff] %v629_v18 }
 0x2fd   :  { %658 = vst [vmem:[#allocation5] sm:$0xff] %v626_v61  ;;  %659 = vst [vmem:[#allocation5 + $0x8] sm:$0xff] %v627_v29  ;;  %v570_v50 = vpop.permute.xlu1 %569  ;;  %v578_v63 = vpop.permute.xlu0 %577 }
 0x2fe   :  { %v630_v32 = vmul.f32 %v570_v50, %v860_v14  ;;  %v631_v33 = vmul.f32 %v570_v50, %v862_v15  ;;  %v634_v13 = vmul.f32 %v578_v63, %v892_v30  ;;  %v635_v8 = vmul.f32 %v578_v63, %v894_v31 }
 0x300   :  { %662 = vst [vmem:[#allocation5 + $0x20] sm:$0xff] %v630_v32  ;;  %663 = vst [vmem:[#allocation5 + $0x28] sm:$0xff] %v631_v33 }
 0x301   :  { %666 = vst [vmem:[#allocation5 + $0x40] sm:$0xff] %v634_v13  ;;  %667 = vst [vmem:[#allocation5 + $0x48] sm:$0xff] %v635_v8  ;;  %v574_v2 = vpop.permute.xlu1 %573  ;;  %v586_v4 = vpop.permute.xlu0 %585 }
 0x302   :  { %v632_v9 = vmul.f32 %v574_v2, %v872_v20  ;;  %v633_v27 = vmul.f32 %v574_v2, %v874_v21  ;;  %v638_v28 = vmul.f32 %v586_v4, %v924_v46  ;;  %v639_v14 = vmul.f32 %v586_v4, %v926_v47 }
 0x304   :  { %664 = vst [vmem:[#allocation5 + $0x30] sm:$0xff] %v632_v9  ;;  %665 = vst [vmem:[#allocation5 + $0x38] sm:$0xff] %v633_v27 }
 0x305   :  { %670 = vst [vmem:[#allocation5 + $0x60] sm:$0xff] %v638_v28  ;;  %671 = vst [vmem:[#allocation5 + $0x68] sm:$0xff] %v639_v14  ;;  %v582_v15 = vpop.permute.xlu1 %581  ;;  %v597_v30 = vpop.permute.xlu0 %596 }
 0x306   :  { %v636_v31 = vmul.f32 %v582_v15, %v908_v38  ;;  %v637_v41 = vmul.f32 %v582_v15, %v910_v39  ;;  %v642_v26 = vmul.f32 %v597_v30, %v832_v0  ;;  %v643_v20 = vmul.f32 %v597_v30, %v834_v1  ;;  %v1176_v39 = vld [vmem:[#allocation8_spill] sm:$0xff] }
 0x308   :  { %668 = vst [vmem:[#allocation5 + $0x50] sm:$0xff] %v636_v31  ;;  %669 = vst [vmem:[#allocation5 + $0x58] sm:$0xff] %v637_v41 }
 0x309   :  { %674 = vst [vmem:[#allocation5 + $0x80] sm:$0xff] %v642_v26  ;;  %675 = vst [vmem:[#allocation5 + $0x88] sm:$0xff] %v643_v20  ;;  %v590_v21 = vpop.permute.xlu1 %589  ;;  %v605_v46 = vpop.permute.xlu0 %604 }
 0x30a   :  { %v640_v47 = vmul.f32 %v590_v21, %v940_v54  ;;  %v641_v3 = vmul.f32 %v590_v21, %v942_v55  ;;  %v646_v34 = vmul.f32 %v605_v46, %v856_v12  ;;  %v647_v38 = vmul.f32 %v605_v46, %v1175_v42 }
 0x30c   :  { %672 = vst [vmem:[#allocation5 + $0x70] sm:$0xff] %v640_v47  ;;  %673 = vst [vmem:[#allocation5 + $0x78] sm:$0xff] %v641_v3 }
 0x30d   :  { %678 = vst [vmem:[#allocation5 + $0xa0] sm:$0xff] %v646_v34  ;;  %679 = vst [vmem:[#allocation5 + $0xa8] sm:$0xff] %v647_v38  ;;  %v601_v0 = vpop.permute.xlu1 %600  ;;  %v613_v1 = vpop.permute.xlu0 %612 }
 0x30e   :  { %v644_v25 = vmul.f32 %v601_v0, %v1176_v39  ;;  %v645_v40 = vmul.f32 %v601_v0, %v1177_v22  ;;  %v650_v48 = vmul.f32 %v613_v1, %v1178_v43  ;;  %v651_v54 = vmul.f32 %v613_v1, %v1179_v11 }
 0x310   :  { %676 = vst [vmem:[#allocation5 + $0x90] sm:$0xff] %v644_v25  ;;  %677 = vst [vmem:[#allocation5 + $0x98] sm:$0xff] %v645_v40 }
 0x311   :  { %682 = vst [vmem:[#allocation5 + $0xc0] sm:$0xff] %v650_v48  ;;  %683 = vst [vmem:[#allocation5 + $0xc8] sm:$0xff] %v651_v54  ;;  %v609_v12 = vpop.permute.xlu1 %608  ;;  %v621_v55 = vpop.permute.xlu0 %620 }
 0x312   :  { %v648_v10 = vmul.f32 %v609_v12, %v1180_v17  ;;  %v649_v58 = vmul.f32 %v609_v12, %v1181_v35  ;;  %v654_v59 = vmul.f32 %v621_v55, %v1182_v6  ;;  %v655_v16 = vmul.f32 %v621_v55, %v1183_v53 }
 0x314   :  { %680 = vst [vmem:[#allocation5 + $0xb0] sm:$0xff] %v648_v10  ;;  %681 = vst [vmem:[#allocation5 + $0xb8] sm:$0xff] %v649_v58 }
 0x315   :  { %686 = vst [vmem:[#allocation5 + $0xe0] sm:$0xff] %v654_v59  ;;  %687 = vst [vmem:[#allocation5 + $0xe8] sm:$0xff] %v655_v16  ;;  %v617_v24 = vpop.permute.xlu1 %616 }
 0x316   :  { %v652_v51 = vmul.f32 %v617_v24, %v1184_v60  ;;  %v653_v5 = vmul.f32 %v617_v24, %v1185_v57 }
 0x318   :  { %684 = vst [vmem:[#allocation5 + $0xd0] sm:$0xff] %v652_v51  ;;  %685 = vst [vmem:[#allocation5 + $0xd8] sm:$0xff] %v653_v5 }
 0x319   :  { %v625_v52 = vpop.permute.xlu1 %624 }
 0x31a   :  { %v656_v23 = vmul.f32 %v625_v52, %v1186_v56  ;;  %v657_v37 = vmul.f32 %v625_v52, %v1187_v49 }
 0x31c   :  { %688 = vst [vmem:[#allocation5 + $0xf0] sm:$0xff] %v656_v23  ;;  %689 = vst [vmem:[#allocation5 + $0xf8] sm:$0xff] %v657_v37 }
 0x31d   :  { %787 = shalt.err (!%p784_p9)
}
 0x31e   :  { %701 = dma.vmem_to_hbm [thread:$0]  %s696_s8, 4096, %s1148_s3, [#allocation4], %s801_s15, %s801_s15, %s802_s16  }
 0x31f   :  { %798 = dma.done.wait [#allocation4], 4096  }
 0x320   :  { %799 = vsyncadd [#allocation4], 4294963200 }
 0x321   :  { %705 = vsyncpa [#allocation3], 1 }
 0x322   :  { %706 = vsyncpa [#allocation4], 1 }

</bundles_post_ra>
